<compile_context>
chip_gen: v7x
topology: tpu7x:2x2x1
jax: 0.10.0
libtpu: 0.0.40
codegen_flags: <defaults>
</compile_context>

<pallas_src>
import jax
import jax.numpy as jnp
from jax.experimental import pallas as pl
from jax.experimental.pallas import tpu as pltpu

d_model = 64
nhead = 8
num_encoder_layers = 6
output_size = 1
dropout = 0.01  # eval-mode -> identity

# Row tile (lane axis).  Multiple of 128.
TM_MAX = 4096


def _round_up(x, m):
    return (x + m - 1) // m * m


def jamba_head_kernel(x_ref,
                      w_in_ref, b_in_ref,
                      w_f2_ref, b_f2_ref,
                      w_m2_ref, b_m2_ref,
                      w_m3_ref, b_m3_ref,
                      w_out_ref, b_out_ref,
                      o_ref):
    """Fused 5-layer MLP head over one row tile.

    x_ref: (F, TM) bf16 -- flattened (batch*seq) rows live on the 128-lane axis.
    Weights are bf16 in PyTorch (out, in) layout, so every layer is W @ act with the
    streaming TM dim on lanes; accumulation is f32 on the MXU, biases added in f32.
    """

    def softsign(h):
        # x / (1 + |x|); approx reciprocal runs on the EUP (separate bundle slot).
        return h * pl.reciprocal(1.0 + jnp.abs(h), approx=True)

    def layer(w_ref, b_ref, act_bf16):
        return jnp.dot(w_ref[...], act_bf16,
                       preferred_element_type=jnp.float32) + b_ref[...]

    x = x_ref[...]                                        # (F, TM) bf16
    # linear_in (no activation)
    h = layer(w_in_ref, b_in_ref, x)                      # (d_model, TM) f32
    # TODO(synk): JambaBlock is not defined in the provided source module; the
    # num_encoder_layers Jamba blocks are treated as identity here.
    # softsign(linear_f2); dropout (eval mode) -> identity
    h = softsign(layer(w_f2_ref, b_f2_ref, h.astype(jnp.bfloat16)))
    # softsign(linear_mid2)
    h = softsign(layer(w_m2_ref, b_m2_ref, h.astype(jnp.bfloat16)))
    # softsign(linear_mid3)
    h = softsign(layer(w_m3_ref, b_m3_ref, h.astype(jnp.bfloat16)))
    # linear_out: (1, d_model) @ (d_model, TM) -> (1, TM): lane-dense output store.
    o_ref[...] = layer(w_out_ref, b_out_ref,
                       h.astype(jnp.bfloat16)).astype(o_ref.dtype)


def init_linear(key, fan_in, fan_out, dtype=jnp.float32):
    """PyTorch nn.Linear default init: U(-1/sqrt(fan_in), 1/sqrt(fan_in))."""
    kw, kb = jax.random.split(key)
    bound = 1.0 / (fan_in ** 0.5)
    # stored in PyTorch (out, in) layout; kernel computes W @ x_t directly
    w = jax.random.uniform(kw, (fan_out, fan_in), dtype, -bound, bound)
    b = jax.random.uniform(kb, (fan_out, 1), dtype, -bound, bound)
    return w, b


def make_params(key, input_features):
    keys = jax.random.split(key, 5)
    return {
        "in":   init_linear(keys[0], input_features, d_model),
        "f2":   init_linear(keys[1], d_model, d_model),
        "mid2": init_linear(keys[2], d_model, d_model),
        "mid3": init_linear(keys[3], d_model, d_model),
        "out":  init_linear(keys[4], d_model, output_size),
    }


def jamba_model_forward(src, params):
    """src: (batch, seq, input_features) float32 -> (batch, seq, output_size)."""
    B, S, F = src.shape
    rows = B * S
    tm = min(TM_MAX, _round_up(rows, 128))
    rows_padded = _round_up(rows, tm)
    num_tiles = rows_padded // tm

    # Feature-major bf16 activations: halves the x HBM read inside the kernel and puts
    # the row axis on lanes so the final width-1 projection stores lane-dense.
    xt = jnp.transpose(src.reshape(rows, F)).astype(jnp.bfloat16)      # (F, rows)
    xt = jnp.pad(xt, ((0, 0), (0, rows_padded - rows)))

    bf16 = jnp.bfloat16
    w_in, b_in = params["in"][0].astype(bf16), params["in"][1]         # (64,F)/(64,1)
    w_f2, b_f2 = params["f2"][0].astype(bf16), params["f2"][1]
    w_m2, b_m2 = params["mid2"][0].astype(bf16), params["mid2"][1]
    w_m3, b_m3 = params["mid3"][0].astype(bf16), params["mid3"][1]
    w_out, b_out = params["out"][0].astype(bf16), params["out"][1]

    const = lambda i: (0, 0)   # grid-invariant: weights/biases stay VMEM-resident
    out = pl.pallas_call(
        jamba_head_kernel,
        out_shape=jax.ShapeDtypeStruct((output_size, rows_padded), jnp.float32),
        grid=(num_tiles,),
        in_specs=[
            pl.BlockSpec((F, tm), lambda i: (0, i)),          # x tile (double-buffered)
            pl.BlockSpec((d_model, F), const),
            pl.BlockSpec((d_model, 1), const),
            pl.BlockSpec((d_model, d_model), const),
            pl.BlockSpec((d_model, 1), const),
            pl.BlockSpec((d_model, d_model), const),
            pl.BlockSpec((d_model, 1), const),
            pl.BlockSpec((d_model, d_model), const),
            pl.BlockSpec((d_model, 1), const),
            pl.BlockSpec((output_size, d_model), const),
            pl.BlockSpec((output_size, 1), const),
        ],
        out_specs=pl.BlockSpec((output_size, tm), lambda i: (0, i)),
        compiler_params=pltpu.CompilerParams(
            dimension_semantics=("parallel",),   # megacore sharding (2 TCs on v7x)
            vmem_limit_bytes=32 * 1024 * 1024,
        ),
    )(xt, w_in, b_in, w_f2, b_f2, w_m2, b_m2, w_m3, b_m3, w_out, b_out)

    # (output_size, rows_padded) -> (B, S, output_size)
    return jnp.transpose(out[:, :rows]).reshape(B, S, output_size)


def reference_forward(src, params):
    """Pure-JAX reference mirroring the kernel's bf16-matmul / f32-accumulate math."""
    B, S, F = src.shape
    x = src.reshape(B * S, F)

    def lin(a, w, b):
        return jnp.dot(a.astype(jnp.bfloat16), w.T.astype(jnp.bfloat16),
                       preferred_element_type=jnp.float32) + b[:, 0]

    def softsign(h):
        return h / (1.0 + jnp.abs(h))

    h = lin(x, *params["in"])
    h = softsign(lin(h, *params["f2"]))
    h = softsign(lin(h, *params["mid2"]))
    h = softsign(lin(h, *params["mid3"]))
    out = lin(h, *params["out"])
    return out.reshape(B, S, output_size)


if __name__ == "__main__":
    key = jax.random.PRNGKey(0)
    k_x, k_p = jax.random.split(key)

    batch, seq, input_features = 2, 8, 16
    src = jax.random.normal(k_x, (batch, seq, input_features), jnp.float32)
    params = make_params(k_p, input_features)

    fwd = jax.jit(jamba_model_forward)
    out = jax.block_until_ready(fwd(src, params))

    ref = reference_forward(src, params)
    assert out.shape == (batch, seq, output_size)
    err = float(jnp.max(jnp.abs(out - ref)))
    # tolerance covers bf16 matmul inputs + EUP approx-reciprocal in softsign
    assert jnp.allclose(out, ref, atol=1e-2, rtol=1e-2), err

    print("KERNEL_OK")
</pallas_src>

<mosaic_0001>
module attributes {stable_mosaic.version = 11 : i64} {
  func.func @jamba_head_kernel(%arg0: i32, %arg1: memref<16x128xbf16, #tpu.memory_space<vmem>>, %arg2: memref<64x16xbf16, #tpu.memory_space<vmem>>, %arg3: memref<64x1xf32, #tpu.memory_space<vmem>>, %arg4: memref<64x64xbf16, #tpu.memory_space<vmem>>, %arg5: memref<64x1xf32, #tpu.memory_space<vmem>>, %arg6: memref<64x64xbf16, #tpu.memory_space<vmem>>, %arg7: memref<64x1xf32, #tpu.memory_space<vmem>>, %arg8: memref<64x64xbf16, #tpu.memory_space<vmem>>, %arg9: memref<64x1xf32, #tpu.memory_space<vmem>>, %arg10: memref<1x64xbf16, #tpu.memory_space<vmem>>, %arg11: memref<1x1xf32, #tpu.memory_space<vmem>>, %arg12: memref<1x128xf32, #tpu.memory_space<vmem>>) attributes {dimension_semantics = [#tpu.dimension_semantics<parallel>], iteration_bounds = array<i64: 1>, scalar_prefetch = 0 : i64, scratch_operands = 0 : i64, tpu.core_type = #tpu.core_type<tc>, window_params = [{transform_indices = @transform_0, window_bounds = array<i64: 16, 128>}, {pipeline_mode = #tpu.pipeline_mode<synchronous>, transform_indices = @transform_1, window_bounds = array<i64: 64, 16>}, {pipeline_mode = #tpu.pipeline_mode<synchronous>, transform_indices = @transform_2, window_bounds = array<i64: 64, 1>}, {pipeline_mode = #tpu.pipeline_mode<synchronous>, transform_indices = @transform_3, window_bounds = array<i64: 64, 64>}, {pipeline_mode = #tpu.pipeline_mode<synchronous>, transform_indices = @transform_4, window_bounds = array<i64: 64, 1>}, {pipeline_mode = #tpu.pipeline_mode<synchronous>, transform_indices = @transform_5, window_bounds = array<i64: 64, 64>}, {pipeline_mode = #tpu.pipeline_mode<synchronous>, transform_indices = @transform_6, window_bounds = array<i64: 64, 1>}, {pipeline_mode = #tpu.pipeline_mode<synchronous>, transform_indices = @transform_7, window_bounds = array<i64: 64, 64>}, {pipeline_mode = #tpu.pipeline_mode<synchronous>, transform_indices = @transform_8, window_bounds = array<i64: 64, 1>}, {pipeline_mode = #tpu.pipeline_mode<synchronous>, transform_indices = @transform_9, window_bounds = array<i64: 1, 64>}, {pipeline_mode = #tpu.pipeline_mode<synchronous>, transform_indices = @transform_10, window_bounds = array<i64: 1, 1>}, {transform_indices = @transform_11, window_bounds = array<i64: 1, 128>}]} {
    %c0 = arith.constant 0 : index
    %c0_0 = arith.constant 0 : index
    %0 = vector.load %arg1[%c0, %c0_0] : memref<16x128xbf16, #tpu.memory_space<vmem>>, vector<16x128xbf16>
    %c0_1 = arith.constant 0 : index
    %c0_2 = arith.constant 0 : index
    %1 = vector.load %arg2[%c0_1, %c0_2] : memref<64x16xbf16, #tpu.memory_space<vmem>>, vector<64x16xbf16>
    %cst = arith.constant dense<0.000000e+00> : vector<64x128xf32>
    %2 = tpu.matmul %1, %0, %cst {dimension_numbers = #tpu.dot_dimension_numbers<[1], [0], [0], [1], [0, 0, 1, 1], [], []>} : vector<64x16xbf16>, vector<16x128xbf16>, vector<64x128xf32> -> vector<64x128xf32>
    %c0_3 = arith.constant 0 : index
    %c0_4 = arith.constant 0 : index
    %3 = vector.load %arg3[%c0_3, %c0_4] : memref<64x1xf32, #tpu.memory_space<vmem>>, vector<64x1xf32>
    %4 = vector.broadcast %3 : vector<64x1xf32> to vector<64x128xf32>
    %5 = arith.addf %2, %4 : vector<64x128xf32>
    %6 = arith.truncf %5 : vector<64x128xf32> to vector<64x128xbf16>
    %c0_5 = arith.constant 0 : index
    %c0_6 = arith.constant 0 : index
    %7 = vector.load %arg4[%c0_5, %c0_6] : memref<64x64xbf16, #tpu.memory_space<vmem>>, vector<64x64xbf16>
    %cst_7 = arith.constant dense<0.000000e+00> : vector<64x128xf32>
    %8 = tpu.matmul %7, %6, %cst_7 {dimension_numbers = #tpu.dot_dimension_numbers<[1], [0], [0], [1], [0, 0, 1, 1], [], []>} : vector<64x64xbf16>, vector<64x128xbf16>, vector<64x128xf32> -> vector<64x128xf32>
    %c0_8 = arith.constant 0 : index
    %c0_9 = arith.constant 0 : index
    %9 = vector.load %arg5[%c0_8, %c0_9] : memref<64x1xf32, #tpu.memory_space<vmem>>, vector<64x1xf32>
    %10 = vector.broadcast %9 : vector<64x1xf32> to vector<64x128xf32>
    %11 = arith.addf %8, %10 : vector<64x128xf32>
    %12 = math.absf %11 : vector<64x128xf32>
    %cst_10 = arith.constant 1.000000e+00 : f32
    %13 = vector.broadcast %cst_10 : f32 to vector<64x128xf32>
    %14 = arith.addf %13, %12 : vector<64x128xf32>
    %15 = tpu.reciprocal %14 {approx = true} : vector<64x128xf32> -> vector<64x128xf32>
    %16 = arith.mulf %11, %15 : vector<64x128xf32>
    %17 = arith.truncf %16 : vector<64x128xf32> to vector<64x128xbf16>
    %c0_11 = arith.constant 0 : index
    %c0_12 = arith.constant 0 : index
    %18 = vector.load %arg6[%c0_11, %c0_12] : memref<64x64xbf16, #tpu.memory_space<vmem>>, vector<64x64xbf16>
    %cst_13 = arith.constant dense<0.000000e+00> : vector<64x128xf32>
    %19 = tpu.matmul %18, %17, %cst_13 {dimension_numbers = #tpu.dot_dimension_numbers<[1], [0], [0], [1], [0, 0, 1, 1], [], []>} : vector<64x64xbf16>, vector<64x128xbf16>, vector<64x128xf32> -> vector<64x128xf32>
    %c0_14 = arith.constant 0 : index
    %c0_15 = arith.constant 0 : index
    %20 = vector.load %arg7[%c0_14, %c0_15] : memref<64x1xf32, #tpu.memory_space<vmem>>, vector<64x1xf32>
    %21 = vector.broadcast %20 : vector<64x1xf32> to vector<64x128xf32>
    %22 = arith.addf %19, %21 : vector<64x128xf32>
    %23 = math.absf %22 : vector<64x128xf32>
    %cst_16 = arith.constant 1.000000e+00 : f32
    %24 = vector.broadcast %cst_16 : f32 to vector<64x128xf32>
    %25 = arith.addf %24, %23 : vector<64x128xf32>
    %26 = tpu.reciprocal %25 {approx = true} : vector<64x128xf32> -> vector<64x128xf32>
    %27 = arith.mulf %22, %26 : vector<64x128xf32>
    %28 = arith.truncf %27 : vector<64x128xf32> to vector<64x128xbf16>
    %c0_17 = arith.constant 0 : index
    %c0_18 = arith.constant 0 : index
    %29 = vector.load %arg8[%c0_17, %c0_18] : memref<64x64xbf16, #tpu.memory_space<vmem>>, vector<64x64xbf16>
    %cst_19 = arith.constant dense<0.000000e+00> : vector<64x128xf32>
    %30 = tpu.matmul %29, %28, %cst_19 {dimension_numbers = #tpu.dot_dimension_numbers<[1], [0], [0], [1], [0, 0, 1, 1], [], []>} : vector<64x64xbf16>, vector<64x128xbf16>, vector<64x128xf32> -> vector<64x128xf32>
    %c0_20 = arith.constant 0 : index
    %c0_21 = arith.constant 0 : index
    %31 = vector.load %arg9[%c0_20, %c0_21] : memref<64x1xf32, #tpu.memory_space<vmem>>, vector<64x1xf32>
    %32 = vector.broadcast %31 : vector<64x1xf32> to vector<64x128xf32>
    %33 = arith.addf %30, %32 : vector<64x128xf32>
    %34 = math.absf %33 : vector<64x128xf32>
    %cst_22 = arith.constant 1.000000e+00 : f32
    %35 = vector.broadcast %cst_22 : f32 to vector<64x128xf32>
    %36 = arith.addf %35, %34 : vector<64x128xf32>
    %37 = tpu.reciprocal %36 {approx = true} : vector<64x128xf32> -> vector<64x128xf32>
    %38 = arith.mulf %33, %37 : vector<64x128xf32>
    %39 = arith.truncf %38 : vector<64x128xf32> to vector<64x128xbf16>
    %c0_23 = arith.constant 0 : index
    %c0_24 = arith.constant 0 : index
    %40 = vector.load %arg10[%c0_23, %c0_24] : memref<1x64xbf16, #tpu.memory_space<vmem>>, vector<1x64xbf16>
    %cst_25 = arith.constant dense<0.000000e+00> : vector<1x128xf32>
    %41 = tpu.matmul %40, %39, %cst_25 {dimension_numbers = #tpu.dot_dimension_numbers<[1], [0], [0], [1], [0, 0, 1, 1], [], []>} : vector<1x64xbf16>, vector<64x128xbf16>, vector<1x128xf32> -> vector<1x128xf32>
    %c0_26 = arith.constant 0 : index
    %c0_27 = arith.constant 0 : index
    %42 = vector.load %arg11[%c0_26, %c0_27] : memref<1x1xf32, #tpu.memory_space<vmem>>, vector<1x1xf32>
    %43 = vector.broadcast %42 : vector<1x1xf32> to vector<1x128xf32>
    %44 = arith.addf %41, %43 : vector<1x128xf32>
    %c0_28 = arith.constant 0 : index
    %c0_29 = arith.constant 0 : index
    %45 = vector.load %arg12[%c0_28, %c0_29] : memref<1x128xf32, #tpu.memory_space<vmem>>, vector<1x128xf32>
    tpu.vector_store %arg12[%c0_28, %c0_29], %44 {strides = array<i32>} : memref<1x128xf32, #tpu.memory_space<vmem>>, vector<1x128xf32>,
    return
  }
  func.func @transform_0(%arg0: i32) -> (i32, i32) {
    %c0_i32 = arith.constant 0 : i32
    %c0_i32_0 = arith.constant 0 : i32
    return %c0_i32, %arg0 : i32, i32
  }
  func.func @transform_1(%arg0: i32) -> (i32, i32) {
    %c0_i32 = arith.constant 0 : i32
    %c0_i32_0 = arith.constant 0 : i32
    %c0_i32_1 = arith.constant 0 : i32
    return %c0_i32, %c0_i32_0 : i32, i32
  }
  func.func @transform_2(%arg0: i32) -> (i32, i32) {
    %c0_i32 = arith.constant 0 : i32
    %c0_i32_0 = arith.constant 0 : i32
    %c0_i32_1 = arith.constant 0 : i32
    return %c0_i32, %c0_i32_0 : i32, i32
  }
  func.func @transform_3(%arg0: i32) -> (i32, i32) {
    %c0_i32 = arith.constant 0 : i32
    %c0_i32_0 = arith.constant 0 : i32
    %c0_i32_1 = arith.constant 0 : i32
    return %c0_i32, %c0_i32_0 : i32, i32
  }
  func.func @transform_4(%arg0: i32) -> (i32, i32) {
    %c0_i32 = arith.constant 0 : i32
    %c0_i32_0 = arith.constant 0 : i32
    %c0_i32_1 = arith.constant 0 : i32
    return %c0_i32, %c0_i32_0 : i32, i32
  }
  func.func @transform_5(%arg0: i32) -> (i32, i32) {
    %c0_i32 = arith.constant 0 : i32
    %c0_i32_0 = arith.constant 0 : i32
    %c0_i32_1 = arith.constant 0 : i32
    return %c0_i32, %c0_i32_0 : i32, i32
  }
  func.func @transform_6(%arg0: i32) -> (i32, i32) {
    %c0_i32 = arith.constant 0 : i32
    %c0_i32_0 = arith.constant 0 : i32
    %c0_i32_1 = arith.constant 0 : i32
    return %c0_i32, %c0_i32_0 : i32, i32
  }
  func.func @transform_7(%arg0: i32) -> (i32, i32) {
    %c0_i32 = arith.constant 0 : i32
    %c0_i32_0 = arith.constant 0 : i32
    %c0_i32_1 = arith.constant 0 : i32
    return %c0_i32, %c0_i32_0 : i32, i32
  }
  func.func @transform_8(%arg0: i32) -> (i32, i32) {
    %c0_i32 = arith.constant 0 : i32
    %c0_i32_0 = arith.constant 0 : i32
    %c0_i32_1 = arith.constant 0 : i32
    return %c0_i32, %c0_i32_0 : i32, i32
  }
  func.func @transform_9(%arg0: i32) -> (i32, i32) {
    %c0_i32 = arith.constant 0 : i32
    %c0_i32_0 = arith.constant 0 : i32
    %c0_i32_1 = arith.constant 0 : i32
    return %c0_i32, %c0_i32_0 : i32, i32
  }
  func.func @transform_10(%arg0: i32) -> (i32, i32) {
    %c0_i32 = arith.constant 0 : i32
    %c0_i32_0 = arith.constant 0 : i32
    %c0_i32_1 = arith.constant 0 : i32
    return %c0_i32, %c0_i32_0 : i32, i32
  }
  func.func @transform_11(%arg0: i32) -> (i32, i32) {
    %c0_i32 = arith.constant 0 : i32
    %c0_i32_0 = arith.constant 0 : i32
    return %c0_i32, %arg0 : i32, i32
  }
}

</mosaic_0001>

<bundles_post_ra>
// kernel: jamba_model_forward.1
= control target key start
LH: loop header
LB: loop body
LE: loop exit
PB: predicated region body
PF: predicated region fallthrough
CT: control target
= control target key end

     0   :  { %vm125_vm0 = vcmask 130048   ;;  %v1042_v1 = vmov 0   ;;  %vm283_vm1 = vcmask 523264   ;;  %vm1044_vm2 = vmmov 0   ;;  %s1283_s0 = inlined_call_operand.vmem [shape: bf16[16,128], index: 0, kind: input, shape index: {}]   ;;  %s1284_s1 = inlined_call_operand.vmem [shape: bf16[64,16], index: 1, kind: input, shape index: {}]   ;;  %s1285_s10 = inlined_call_operand.<no memory space> [shape: f32[1,1], index: 10, kind: input, shape index: {}]   ;;  %s1286_s2 = inlined_call_operand.vmem [shape: f32[64,1], index: 2, kind: input, shape index: {}]   ;;  %s1287_s4 = inlined_call_operand.vmem [shape: f32[64,1], index: 4, kind: input, shape index: {}]   ;;  %s1288_s6 = inlined_call_operand.vmem [shape: f32[64,1], index: 6, kind: input, shape index: {}]   ;;  %s1289_s8 = inlined_call_operand.vmem [shape: f32[64,1], index: 8, kind: input, shape index: {}]   ;;  %s1290_s3 = inlined_call_operand.vmem [shape: bf16[64,64], index: 3, kind: input, shape index: {}]   ;;  %s1291_s5 = inlined_call_operand.vmem [shape: bf16[64,64], index: 5, kind: input, shape index: {}]   ;;  %s1292_s7 = inlined_call_operand.vmem [shape: bf16[64,64], index: 7, kind: input, shape index: {}]   ;;  %s1293_s9 = inlined_call_operand.vmem [shape: bf16[1,64], index: 9, kind: input, shape index: {}]   ;;  %s1294_s11 = inlined_call_operand.vmem [shape: f32[1,128], index: 11, kind: output, shape index: {}]  }
   0x1   :  { %v977_v0 = vld [vmem:[%s1283_s0] sm:$0xff]   ;;  %975 = vset.pattern.permute.xlu0 %v1042_v1  ;;  %976 = vset.pattern.permute.xlu1 %v1042_v1  ;;  %v16_v2 = vstv %s1285_s10  ;;  %v979_v4 = vld [vmem:[%s1284_s1 + $0x8] sm:$0xff]   ;;  %v980_v5 = vld [vmem:[%s1284_s1 + $0x10] sm:$0xff]  }
   0x2   :  { %v978_v3 = vld [vmem:[%s1284_s1] sm:$0xff]   ;;  %17 = vst [vmem:[#allocation2] sm:$0x1] %v16_v2  ;;  %902 = vmatprep.subr.bf16.mxu0 %v977_v0  ;;  %v53_v7 = vld [vmem:[%s1286_s2 + $0x10] sm:$0xff]  ;;  %v52_v8 = vld [vmem:[%s1286_s2 + $0x8] sm:$0xff] }
   0x3   :  { %903 = vmatpush3.bf16.msra.mxu0 %v977_v0  ;;  %904 = vmatprep.mubr.msk.bf16.mxu0 %vm125_vm0, %v978_v3  ;;  %v51_v6 = vld [vmem:[%s1286_s2] sm:$0xff]  ;;  %v54_v9 = vld [vmem:[%s1286_s2 + $0x18] sm:$0xff]  ;;  %v56_v12 = vld [vmem:[%s1286_s2 + $0x28] sm:$0xff] }
   0x4   :  { %61 = vperm.xlu0 %975, %v51_v6   ;;  %71 = vperm.xlu1 %976, %v53_v7   ;;  %v981_v10 = vld [vmem:[%s1284_s1 + $0x18] sm:$0xff]   ;;  %v55_v11 = vld [vmem:[%s1286_s2 + $0x20] sm:$0xff]  ;;  %v57_v13 = vld [vmem:[%s1286_s2 + $0x30] sm:$0xff] }
   0x5   :  { %v58_v14 = vld [vmem:[%s1286_s2 + $0x38] sm:$0xff]  ;;  %v215_v15 = vld [vmem:[%s1287_s4] sm:$0xff]  ;;  %v216_v16 = vld [vmem:[%s1287_s4 + $0x8] sm:$0xff] }
   0x6   :  { %905 = vmatmul.mubr.msk.bf16.vlgmr.msra.gmra.mrb[0].mxu0 %vm125_vm0, %v979_v4  ;;  %v217_v17 = vld [vmem:[%s1287_s4 + $0x10] sm:$0xff]  ;;  %v218_v18 = vld [vmem:[%s1287_s4 + $0x18] sm:$0xff]  ;;  %v219_v19 = vld [vmem:[%s1287_s4 + $0x20] sm:$0xff] }
   0x7   :  { %908 = vmatprep.mubr.msk.bf16.mxu0 %vm125_vm0, %v980_v5  ;;  %v220_v20 = vld [vmem:[%s1287_s4 + $0x28] sm:$0xff]  ;;  %v221_v21 = vld [vmem:[%s1287_s4 + $0x30] sm:$0xff]  ;;  %v222_v22 = vld [vmem:[%s1287_s4 + $0x38] sm:$0xff] }
   0x8   :  { %66 = vperm.xlu0 %975, %v52_v8   ;;  %76 = vperm.xlu1 %976, %v54_v9   ;;  %v405_v23 = vld [vmem:[%s1288_s6] sm:$0xff]  ;;  %v406_v24 = vld [vmem:[%s1288_s6 + $0x8] sm:$0xff]  ;;  %v407_v25 = vld [vmem:[%s1288_s6 + $0x10] sm:$0xff] }
   0x9   :  { %v408_v26 = vld [vmem:[%s1288_s6 + $0x18] sm:$0xff]  ;;  %v409_v27 = vld [vmem:[%s1288_s6 + $0x20] sm:$0xff]  ;;  %v410_v28 = vld [vmem:[%s1288_s6 + $0x28] sm:$0xff] }
   0xa   :  { %v411_v29 = vld [vmem:[%s1288_s6 + $0x30] sm:$0xff]  ;;  %v412_v30 = vld [vmem:[%s1288_s6 + $0x38] sm:$0xff]  ;;  %v594_v31 = vld [vmem:[%s1289_s8] sm:$0xff] }
   0xb   :  { %v595_v32 = vld [vmem:[%s1289_s8 + $0x8] sm:$0xff]  ;;  %v596_v33 = vld [vmem:[%s1289_s8 + $0x10] sm:$0xff]  ;;  %v597_v34 = vld [vmem:[%s1289_s8 + $0x18] sm:$0xff] }
   0xc   :  { %81 = vperm.xlu0 %975, %v55_v11   ;;  %86 = vperm.xlu1 %976, %v56_v12   ;;  %v598_v35 = vld [vmem:[%s1289_s8 + $0x20] sm:$0xff]  ;;  %v599_v36 = vld [vmem:[%s1289_s8 + $0x28] sm:$0xff]  ;;  %v600_v37 = vld [vmem:[%s1289_s8 + $0x30] sm:$0xff] }
   0xd   :  { %v601_v38 = vld [vmem:[%s1289_s8 + $0x38] sm:$0xff]  ;;  %v776_v39 = vld [vmem:[#allocation2] sm:$0x1]  ;;  %v983_v5 = vld [vmem:[%s1290_s3 + $0x8] sm:$0xff]  }
   0xe   :  { %909 = vmatmul.mubr.msk.bf16.gmra.mrb[4].mxu0 %vm125_vm0, %v981_v10  ;;  %v982_v40 = vld [vmem:[%s1290_s3] sm:$0xff]   ;;  %v984_v6 = vld [vmem:[%s1290_s3 + $0x10] sm:$0xff]   ;;  %v985_v7 = vld [vmem:[%s1290_s3 + $0x18] sm:$0xff]  }
   0xf   :  { %920 = vmatprep.mubr.msk.bf16.mxu1 %vm283_vm1, %v982_v40  ;;  %v986_v8 = vld [vmem:[%s1291_s5] sm:$0xff]  }
  0x10   :  { %91 = vperm.xlu0 %975, %v57_v13   ;;  %96 = vperm.xlu1 %976, %v58_v14  }
  0x11   :  { %936 = vmatprep.mubr.msk.bf16.mxu0 %vm283_vm1, %v986_v8  ;;  %v990_v8 = vld [vmem:[%s1292_s7] sm:$0xff]  }
  0x14   :  { %225 = vperm.xlu0 %975, %v215_v15   ;;  %230 = vperm.xlu1 %976, %v216_v16  }
  0x18   :  { %235 = vperm.xlu0 %975, %v217_v17   ;;  %240 = vperm.xlu1 %976, %v218_v18  }
  0x1c   :  { %245 = vperm.xlu0 %975, %v219_v19   ;;  %250 = vperm.xlu1 %976, %v220_v20  }
  0x20   :  { %255 = vperm.xlu0 %975, %v221_v21   ;;  %260 = vperm.xlu1 %976, %v222_v22  }
  0x24   :  { %415 = vperm.xlu0 %975, %v405_v23   ;;  %420 = vperm.xlu1 %976, %v406_v24  }
  0x28   :  { %425 = vperm.xlu0 %975, %v407_v25   ;;  %430 = vperm.xlu1 %976, %v408_v26  }
  0x2c   :  { %435 = vperm.xlu0 %975, %v409_v27   ;;  %440 = vperm.xlu1 %976, %v410_v28  }
  0x30   :  { %445 = vperm.xlu0 %975, %v411_v29   ;;  %450 = vperm.xlu1 %976, %v412_v30  }
  0x34   :  { %604 = vperm.xlu0 %975, %v594_v31   ;;  %609 = vperm.xlu1 %976, %v595_v32  }
  0x38   :  { %614 = vperm.xlu0 %975, %v596_v33   ;;  %619 = vperm.xlu1 %976, %v597_v34  }
  0x3c   :  { %624 = vperm.xlu0 %975, %v598_v35   ;;  %629 = vperm.xlu1 %976, %v599_v36  }
  0x40   :  { %634 = vperm.xlu0 %975, %v600_v37   ;;  %639 = vperm.xlu1 %976, %v601_v38  }
  0x44   :  { %779 = vperm.xlu0 %975, %v776_v39  }
  0x83   :  { %v62_v41 = vpop.permute.xlu0 %61  ;;  %v72_v42 = vpop.permute.xlu1 %71 }
  0x87   :  { %v67_v43 = vpop.permute.xlu0 %66  ;;  %v77_v44 = vpop.permute.xlu1 %76 }
  0x8b   :  { %v82_v48 = vpop.permute.xlu0 %81  ;;  %v87_v52 = vpop.permute.xlu1 %86 }
  0x8f   :  { %v92_v58 = vpop.permute.xlu0 %91  ;;  %v97_v60 = vpop.permute.xlu1 %96 }
  0x93   :  { %v226_v9 = vpop.permute.xlu0 %225  ;;  %v231_v10 = vpop.permute.xlu1 %230 }
  0x97   :  { %v236_v11 = vpop.permute.xlu0 %235  ;;  %v241_v12 = vpop.permute.xlu1 %240 }
  0x9b   :  { %v246_v16 = vpop.permute.xlu0 %245  ;;  %v251_v22 = vpop.permute.xlu1 %250 }
  0x9f   :  { %v256_v30 = vpop.permute.xlu0 %255  ;;  %v261_v35 = vpop.permute.xlu1 %260 }
  0xd9   :  { %v906_v45 = vpop.f32.mrb[0].mxu0 }
  0xda   :  { %v172_v46 = vpop.f32.mrb[1].mxu0  ;;  %v181_v49 = vadd.f32 %v906_v45, %v72_v42 }
  0xdb   :  { %v907_v47 = vpop.f32.mrb[2].mxu0  ;;  %v173_v53 = vadd.f32 %v172_v46, %v62_v41 }
  0xdc   :  { %v184_v50 = vadd.f32 %v907_v47, %v77_v44  ;;  %v175_v51 = vpop.f32.mrb[3].mxu0 }
  0xdd   :  { %v176_v54 = vadd.f32 %v175_v51, %v67_v43 }
  0xde   :  { %v204_v55 = vpack.c.bf16 %v184_v50, %v181_v49 }
  0xdf   :  { %v203_v56 = vpack.c.bf16 %v176_v54, %v173_v53 }
  0xe1   :  { %v910_v57 = vpop.f32.mrb[4].mxu0  ;;  %912 = vmatprep.subr.bf16.mxu1 %v203_v56 }
  0xe2   :  { %v188_v59 = vpop.f32.mrb[5].mxu0  ;;  %913 = vmatpush3.bf16.msra.mxu1 %v203_v56  ;;  %v197_v62 = vadd.f32 %v910_v57, %v92_v58 }
  0xe3   :  { %v911_v61 = vpop.f32.mrb[6].mxu0  ;;  %914 = vmatprep.subr.bf16.mxu1 %v204_v55  ;;  %v189_v1 = vadd.f32 %v188_v59, %v82_v48 }
  0xe4   :  { %v200_v63 = vadd.f32 %v911_v61, %v97_v60  ;;  %v191_v0 = vpop.f32.mrb[7].mxu0 }
  0xe5   :  { %v192_v2 = vadd.f32 %v191_v0, %v87_v52 }
  0xe6   :  { %v206_v3 = vpack.c.bf16 %v200_v63, %v197_v62  ;;  %915 = vmatpush3.bf16.msra.mxu1 %v204_v55 }
  0xe7   :  { %v205_v4 = vpack.c.bf16 %v192_v2, %v189_v1 }
  0xe9   :  { %916 = vmatprep.subr.bf16.mxu1 %v205_v4 }
  0xea   :  { %917 = vmatpush3.bf16.msra.mxu1 %v205_v4 }
  0xeb   :  { %918 = vmatprep.subr.bf16.mxu1 %v206_v3 }
  0xee   :  { %919 = vmatpush3.bf16.msra.mxu1 %v206_v3 }
  0xf1   :  { %921 = vmatmul.mubr.msk.bf16.vlgmr.msra.gmra.mrb[0].mxu1 %vm283_vm1, %v983_v5  ;;  %v987_v5 = vld [vmem:[%s1291_s5 + $0x8] sm:$0xff]  }
  0xf2   :  { %924 = vmatprep.mubr.msk.bf16.mxu1 %vm283_vm1, %v984_v6  ;;  %v988_v6 = vld [vmem:[%s1291_s5 + $0x10] sm:$0xff]  }
  0xf9   :  { %925 = vmatmul.mubr.msk.bf16.gmra.mrb[4].mxu1 %vm283_vm1, %v985_v7  ;;  %v989_v7 = vld [vmem:[%s1291_s5 + $0x18] sm:$0xff]  }
  0xfa   :  { %952 = vmatprep.mubr.msk.bf16.mxu1 %vm283_vm1, %v990_v8  ;;  %v1043_v8 = vmov 0.0  }
 0x1c4   :  { %v922_v13 = vpop.f32.mrb[0].mxu1 }
 0x1c5   :  { %v339_v14 = vadd.f32 %v922_v13, %v236_v11  ;;  %v330_v15 = vpop.f32.mrb[1].mxu1 }
 0x1c6   :  { %v331_v17 = vadd.f32 %v330_v15, %v226_v9  ;;  %v923_v18 = vpop.f32.mrb[2].mxu1  ;;  %v416_v9 = vpop.permute.xlu0 %415 }
 0x1c7   :  { %v363_v19 = vand.u32 2147483647, %v339_v14  ;;  %v342_v20 = vadd.f32 %v923_v18, %v241_v12  ;;  %v333_v21 = vpop.f32.mrb[3].mxu1 }
 0x1c8   :  { %v361_v23 = vand.u32 2147483647, %v331_v17  ;;  %v334_v24 = vadd.f32 %v333_v21, %v231_v10  ;;  %v421_v10 = vpop.permute.xlu1 %420 }
 0x1c9   :  { %v371_v25 = vadd.f32 1.0, %v363_v19  ;;  %v364_v26 = vand.u32 2147483647, %v342_v20 }
 0x1ca   :  { %v369_v27 = vadd.f32 1.0, %v361_v23  ;;  %v362_v28 = vand.u32 2147483647, %v334_v24  ;;  %v426_v11 = vpop.permute.xlu0 %425 }
 0x1cb   :  { %994 = vrcp.f32 %v371_v25  ;;  %v372_v29 = vadd.f32 1.0, %v364_v26 }
 0x1cc   :  { %996 = vrcp.f32 %v369_v27  ;;  %v370_v31 = vadd.f32 1.0, %v362_v28  ;;  %v926_v32 = vpop.f32.mrb[4].mxu1  ;;  %v431_v12 = vpop.permute.xlu1 %430 }
 0x1cd   :  { %998 = vrcp.f32 %v372_v29  ;;  %v355_v33 = vadd.f32 %v926_v32, %v256_v30  ;;  %v346_v34 = vpop.f32.mrb[5].mxu1 }
 0x1ce   :  { %1000 = vrcp.f32 %v370_v31  ;;  %v347_v36 = vadd.f32 %v346_v34, %v246_v16  ;;  %v927_v37 = vpop.f32.mrb[6].mxu1  ;;  %v436_v16 = vpop.permute.xlu0 %435 }
 0x1cf   :  { %v367_v38 = vand.u32 2147483647, %v355_v33  ;;  %v358_v39 = vadd.f32 %v927_v37, %v261_v35  ;;  %v349_v40 = vpop.f32.mrb[7].mxu1 }
 0x1d0   :  { %v365_v41 = vand.u32 2147483647, %v347_v36  ;;  %v350_v42 = vadd.f32 %v349_v40, %v251_v22  ;;  %v441_v22 = vpop.permute.xlu1 %440 }
 0x1d1   :  { %v375_v43 = vadd.f32 1.0, %v367_v38  ;;  %v368_v44 = vand.u32 2147483647, %v358_v39 }
 0x1d2   :  { %v373_v45 = vadd.f32 1.0, %v365_v41  ;;  %v366_v46 = vand.u32 2147483647, %v350_v42  ;;  %v446_v30 = vpop.permute.xlu0 %445 }
 0x1d3   :  { %1002 = vrcp.f32 %v375_v43  ;;  %v376_v47 = vadd.f32 1.0, %v368_v44 }
 0x1d4   :  { %1004 = vrcp.f32 %v373_v45  ;;  %v374_v48 = vadd.f32 1.0, %v366_v46  ;;  %v451_v35 = vpop.permute.xlu1 %450 }
 0x1d5   :  { %v995_v49 = vpop.eup %994  ;;  %1006 = vrcp.f32 %v376_v47 }
 0x1d6   :  { %v997_v50 = vpop.eup %996  ;;  %1008 = vrcp.f32 %v374_v48  ;;  %v387_v53 = vmul.f32 %v995_v49, %v339_v14 }
 0x1d7   :  { %v999_v51 = vpop.eup %998  ;;  %v385_v55 = vmul.f32 %v997_v50, %v331_v17 }
 0x1d8   :  { %v1001_v52 = vpop.eup %1000  ;;  %v388_v54 = vmul.f32 %v999_v51, %v342_v20 }
 0x1d9   :  { %v386_v56 = vmul.f32 %v1001_v52, %v334_v24 }
 0x1da   :  { %v394_v57 = vpack.c.bf16 %v388_v54, %v387_v53 }
 0x1db   :  { %v393_v58 = vpack.c.bf16 %v386_v56, %v385_v55 }
 0x1dd   :  { %v1003_v59 = vpop.eup %1002  ;;  %928 = vmatprep.subr.bf16.mxu0 %v393_v58 }
 0x1de   :  { %v1005_v60 = vpop.eup %1004  ;;  %929 = vmatpush3.bf16.msra.mxu0 %v393_v58  ;;  %v391_v63 = vmul.f32 %v1003_v59, %v355_v33 }
 0x1df   :  { %v1007_v61 = vpop.eup %1006  ;;  %930 = vmatprep.subr.bf16.mxu0 %v394_v57  ;;  %v389_v1 = vmul.f32 %v1005_v60, %v347_v36 }
 0x1e0   :  { %v1009_v62 = vpop.eup %1008  ;;  %v392_v0 = vmul.f32 %v1007_v61, %v358_v39 }
 0x1e1   :  { %v390_v2 = vmul.f32 %v1009_v62, %v350_v42 }
 0x1e2   :  { %931 = vmatpush3.bf16.msra.mxu0 %v394_v57  ;;  %v396_v3 = vpack.c.bf16 %v392_v0, %v391_v63 }
 0x1e3   :  { %v395_v4 = vpack.c.bf16 %v390_v2, %v389_v1 }
 0x1e5   :  { %932 = vmatprep.subr.bf16.mxu0 %v395_v4 }
 0x1e6   :  { %933 = vmatpush3.bf16.msra.mxu0 %v395_v4 }
 0x1e7   :  { %934 = vmatprep.subr.bf16.mxu0 %v396_v3 }
 0x1ea   :  { %935 = vmatpush3.bf16.msra.mxu0 %v396_v3 }
 0x1eb   :  { %960 = vmatprep.subr.bf16.mxu0 %v1043_v8 }
 0x1ed   :  { %937 = vmatmul.mubr.msk.bf16.vlgmr.msra.gmra.mrb[8].mxu0 %vm283_vm1, %v987_v5  ;;  %v991_v5 = vld [vmem:[%s1292_s7 + $0x8] sm:$0xff]  }
 0x1ee   :  { %940 = vmatprep.mubr.msk.bf16.mxu0 %vm283_vm1, %v988_v6  ;;  %v992_v6 = vld [vmem:[%s1292_s7 + $0x10] sm:$0xff]  }
 0x1f5   :  { %941 = vmatmul.mubr.msk.bf16.gmra.mrb[12].mxu0 %vm283_vm1, %v989_v7  ;;  %v993_v7 = vld [vmem:[%s1292_s7 + $0x18] sm:$0xff]  }
 0x1f6   :  { %968 = vmatprep.mubr.msk.bf16.mxu0 %vm1044_vm2, %v1043_v8 }
 0x2c0   :  { %v938_v13 = vpop.f32.mrb[8].mxu0 }
 0x2c1   :  { %v528_v14 = vadd.f32 %v938_v13, %v426_v11  ;;  %v519_v15 = vpop.f32.mrb[9].mxu0 }
 0x2c2   :  { %v520_v17 = vadd.f32 %v519_v15, %v416_v9  ;;  %v939_v18 = vpop.f32.mrb[10].mxu0  ;;  %v605_v9 = vpop.permute.xlu0 %604 }
 0x2c3   :  { %v552_v19 = vand.u32 2147483647, %v528_v14  ;;  %v531_v20 = vadd.f32 %v939_v18, %v431_v12  ;;  %v522_v21 = vpop.f32.mrb[11].mxu0 }
 0x2c4   :  { %v550_v23 = vand.u32 2147483647, %v520_v17  ;;  %v523_v24 = vadd.f32 %v522_v21, %v421_v10  ;;  %v610_v10 = vpop.permute.xlu1 %609 }
 0x2c5   :  { %v560_v25 = vadd.f32 1.0, %v552_v19  ;;  %v553_v26 = vand.u32 2147483647, %v531_v20 }
 0x2c6   :  { %v558_v27 = vadd.f32 1.0, %v550_v23  ;;  %v551_v28 = vand.u32 2147483647, %v523_v24  ;;  %v615_v11 = vpop.permute.xlu0 %614 }
 0x2c7   :  { %1010 = vrcp.f32 %v560_v25  ;;  %v561_v29 = vadd.f32 1.0, %v553_v26 }
 0x2c8   :  { %1012 = vrcp.f32 %v558_v27  ;;  %v559_v31 = vadd.f32 1.0, %v551_v28  ;;  %v942_v32 = vpop.f32.mrb[12].mxu0  ;;  %v620_v12 = vpop.permute.xlu1 %619 }
 0x2c9   :  { %1014 = vrcp.f32 %v561_v29  ;;  %v544_v33 = vadd.f32 %v942_v32, %v446_v30  ;;  %v535_v34 = vpop.f32.mrb[13].mxu0 }
 0x2ca   :  { %1016 = vrcp.f32 %v559_v31  ;;  %v536_v36 = vadd.f32 %v535_v34, %v436_v16  ;;  %v943_v37 = vpop.f32.mrb[14].mxu0  ;;  %v625_v16 = vpop.permute.xlu0 %624 }
 0x2cb   :  { %v556_v38 = vand.u32 2147483647, %v544_v33  ;;  %v547_v39 = vadd.f32 %v943_v37, %v451_v35  ;;  %v538_v40 = vpop.f32.mrb[15].mxu0 }
 0x2cc   :  { %v554_v41 = vand.u32 2147483647, %v536_v36  ;;  %v539_v42 = vadd.f32 %v538_v40, %v441_v22  ;;  %v630_v22 = vpop.permute.xlu1 %629 }
 0x2cd   :  { %v564_v43 = vadd.f32 1.0, %v556_v38  ;;  %v557_v44 = vand.u32 2147483647, %v547_v39 }
 0x2ce   :  { %v562_v45 = vadd.f32 1.0, %v554_v41  ;;  %v555_v46 = vand.u32 2147483647, %v539_v42  ;;  %v635_v30 = vpop.permute.xlu0 %634 }
 0x2cf   :  { %1018 = vrcp.f32 %v564_v43  ;;  %v565_v47 = vadd.f32 1.0, %v557_v44 }
 0x2d0   :  { %1020 = vrcp.f32 %v562_v45  ;;  %v563_v48 = vadd.f32 1.0, %v555_v46  ;;  %v640_v35 = vpop.permute.xlu1 %639 }
 0x2d1   :  { %v1011_v49 = vpop.eup %1010  ;;  %1022 = vrcp.f32 %v565_v47 }
 0x2d2   :  { %v1013_v50 = vpop.eup %1012  ;;  %1024 = vrcp.f32 %v563_v48  ;;  %v576_v53 = vmul.f32 %v1011_v49, %v528_v14 }
 0x2d3   :  { %v1015_v51 = vpop.eup %1014  ;;  %v574_v55 = vmul.f32 %v1013_v50, %v520_v17 }
 0x2d4   :  { %v1017_v52 = vpop.eup %1016  ;;  %v577_v54 = vmul.f32 %v1015_v51, %v531_v20 }
 0x2d5   :  { %v575_v56 = vmul.f32 %v1017_v52, %v523_v24 }
 0x2d6   :  { %v583_v57 = vpack.c.bf16 %v577_v54, %v576_v53 }
 0x2d7   :  { %v582_v58 = vpack.c.bf16 %v575_v56, %v574_v55 }
 0x2d9   :  { %v1019_v59 = vpop.eup %1018  ;;  %944 = vmatprep.subr.bf16.mxu1 %v582_v58 }
 0x2da   :  { %v1021_v60 = vpop.eup %1020  ;;  %945 = vmatpush3.bf16.msra.mxu1 %v582_v58  ;;  %v580_v63 = vmul.f32 %v1019_v59, %v544_v33 }
 0x2db   :  { %v1023_v61 = vpop.eup %1022  ;;  %946 = vmatprep.subr.bf16.mxu1 %v583_v57  ;;  %v578_v1 = vmul.f32 %v1021_v60, %v536_v36 }
 0x2dc   :  { %v1025_v62 = vpop.eup %1024  ;;  %v581_v0 = vmul.f32 %v1023_v61, %v547_v39 }
 0x2dd   :  { %v579_v2 = vmul.f32 %v1025_v62, %v539_v42 }
 0x2de   :  { %947 = vmatpush3.bf16.msra.mxu1 %v583_v57  ;;  %v585_v3 = vpack.c.bf16 %v581_v0, %v580_v63 }
 0x2df   :  { %v584_v4 = vpack.c.bf16 %v579_v2, %v578_v1 }
 0x2e1   :  { %948 = vmatprep.subr.bf16.mxu1 %v584_v4 }
 0x2e2   :  { %949 = vmatpush3.bf16.msra.mxu1 %v584_v4 }
 0x2e3   :  { %950 = vmatprep.subr.bf16.mxu1 %v585_v3 }
 0x2e6   :  { %951 = vmatpush3.bf16.msra.mxu1 %v585_v3 }
 0x2e9   :  { %953 = vmatmul.mubr.msk.bf16.vlgmr.msra.gmra.mrb[8].mxu1 %vm283_vm1, %v991_v5  ;;  %v775_v5 = vld [vmem:[%s1293_s9] sm:$0x1] }
 0x2ea   :  { %956 = vmatprep.mubr.msk.bf16.mxu1 %vm283_vm1, %v992_v6  ;;  %v782_v6 = vlaneseq }
 0x2f1   :  { %957 = vmatmul.mubr.msk.bf16.gmra.mrb[12].mxu1 %vm283_vm1, %v993_v7  ;;  %v783_v7 = vshrl.u32 %v782_v6, 7 }
 0x3bc   :  { %v954_v13 = vpop.f32.mrb[8].mxu1 }
 0x3bd   :  { %v717_v14 = vadd.f32 %v954_v13, %v615_v11  ;;  %v708_v15 = vpop.f32.mrb[9].mxu1 }
 0x3be   :  { %v709_v17 = vadd.f32 %v708_v15, %v605_v9  ;;  %v955_v18 = vpop.f32.mrb[10].mxu1  ;;  %v784_v9 = vsub.s32 0, %v783_v7 }
 0x3bf   :  { %v741_v19 = vand.u32 2147483647, %v717_v14  ;;  %v720_v20 = vadd.f32 %v955_v18, %v620_v12  ;;  %v711_v21 = vpop.f32.mrb[11].mxu1 }
 0x3c0   :  { %v739_v23 = vand.u32 2147483647, %v709_v17  ;;  %v712_v24 = vadd.f32 %v711_v21, %v610_v10  ;;  %v780_v10 = vpop.permute.xlu0 %779 }
 0x3c1   :  { %v749_v25 = vadd.f32 1.0, %v741_v19  ;;  %v742_v26 = vand.u32 2147483647, %v720_v20  ;;  %v785_v11 = vrot.slane %v780_v10, %v784_v9 }
 0x3c2   :  { %v747_v27 = vadd.f32 1.0, %v739_v23  ;;  %v740_v28 = vand.u32 2147483647, %v712_v24 }
 0x3c3   :  { %1026 = vrcp.f32 %v749_v25  ;;  %v750_v29 = vadd.f32 1.0, %v742_v26 }
 0x3c4   :  { %1028 = vrcp.f32 %v747_v27  ;;  %v748_v31 = vadd.f32 1.0, %v740_v28  ;;  %v958_v32 = vpop.f32.mrb[12].mxu1 }
 0x3c5   :  { %1030 = vrcp.f32 %v750_v29  ;;  %v733_v33 = vadd.f32 %v958_v32, %v635_v30  ;;  %v724_v34 = vpop.f32.mrb[13].mxu1 }
 0x3c6   :  { %1032 = vrcp.f32 %v748_v31  ;;  %v725_v36 = vadd.f32 %v724_v34, %v625_v16  ;;  %v959_v37 = vpop.f32.mrb[14].mxu1 }
 0x3c7   :  { %v745_v38 = vand.u32 2147483647, %v733_v33  ;;  %v736_v39 = vadd.f32 %v959_v37, %v640_v35  ;;  %v727_v40 = vpop.f32.mrb[15].mxu1 }
 0x3c8   :  { %v743_v41 = vand.u32 2147483647, %v725_v36  ;;  %v728_v42 = vadd.f32 %v727_v40, %v630_v22 }
 0x3c9   :  { %v753_v43 = vadd.f32 1.0, %v745_v38  ;;  %v746_v44 = vand.u32 2147483647, %v736_v39 }
 0x3ca   :  { %v751_v45 = vadd.f32 1.0, %v743_v41  ;;  %v744_v46 = vand.u32 2147483647, %v728_v42 }
 0x3cb   :  { %1034 = vrcp.f32 %v753_v43  ;;  %v754_v47 = vadd.f32 1.0, %v746_v44 }
 0x3cc   :  { %1036 = vrcp.f32 %v751_v45  ;;  %v752_v48 = vadd.f32 1.0, %v744_v46 }
 0x3cd   :  { %v1027_v49 = vpop.eup %1026  ;;  %1038 = vrcp.f32 %v754_v47 }
 0x3ce   :  { %v1029_v50 = vpop.eup %1028  ;;  %1040 = vrcp.f32 %v752_v48  ;;  %v765_v53 = vmul.f32 %v1027_v49, %v717_v14 }
 0x3cf   :  { %v1031_v51 = vpop.eup %1030  ;;  %v763_v55 = vmul.f32 %v1029_v50, %v709_v17 }
 0x3d0   :  { %v1033_v52 = vpop.eup %1032  ;;  %v766_v54 = vmul.f32 %v1031_v51, %v720_v20 }
 0x3d1   :  { %v764_v56 = vmul.f32 %v1033_v52, %v712_v24 }
 0x3d2   :  { %v772_v57 = vpack.c.bf16 %v766_v54, %v765_v53 }
 0x3d3   :  { %v771_v58 = vpack.c.bf16 %v764_v56, %v763_v55 }
 0x3d5   :  { %v1035_v59 = vpop.eup %1034  ;;  %961 = vmatpush3.bf16.msra.mxu0 %v771_v58 }
 0x3d6   :  { %v1037_v60 = vpop.eup %1036  ;;  %962 = vmatprep.subr.bf16.mxu0 %v1043_v8  ;;  %v769_v63 = vmul.f32 %v1035_v59, %v733_v33 }
 0x3d7   :  { %v1039_v61 = vpop.eup %1038  ;;  %v767_v1 = vmul.f32 %v1037_v60, %v725_v36 }
 0x3d8   :  { %v1041_v62 = vpop.eup %1040  ;;  %v770_v0 = vmul.f32 %v1039_v61, %v736_v39 }
 0x3d9   :  { %v768_v2 = vmul.f32 %v1041_v62, %v728_v42  ;;  %963 = vmatpush3.bf16.msra.mxu0 %v772_v57 }
 0x3da   :  { %v774_v3 = vpack.c.bf16 %v770_v0, %v769_v63  ;;  %964 = vmatprep.subr.bf16.mxu0 %v1043_v8 }
 0x3db   :  { %v773_v4 = vpack.c.bf16 %v768_v2, %v767_v1 }
 0x3dd   :  { %965 = vmatpush3.bf16.msra.mxu0 %v773_v4 }
 0x3de   :  { %966 = vmatprep.subr.bf16.mxu0 %v1043_v8 }
 0x3e1   :  { %967 = vmatpush3.bf16.msra.mxu0 %v774_v3 }
 0x3e4   :  { %969 = vmatmul.mubr.msk.bf16.vlgmr.msra.gmra.mrb[16].mxu0 %vm283_vm1, %v775_v5 }
 0x4b7   :  { %v823_v12 = vpop.f32.mrb[16].mxu0 }
 0x4b8   :  { %v824_v13 = vadd.f32 %v823_v12, %v785_v11  ;;  %v970_v14 = vpop.f32.mrb[17].mxu0 }
 0x4b9   :  { %v826_v15 = vpop.f32.mrb[18].mxu0 }
 0x4ba   :  { %829 = vst [vmem:[%s1294_s11] sm:$0x1] %v824_v13  ;;  %v971_v8 = vpop.f32.mrb[19].mxu0 }

</bundles_post_ra>
